<compile_context>
chip_gen: v5e
topology: v5e:2x2
jax: 0.10.0
libtpu: 0.0.40
codegen_flags: <defaults>
</compile_context>

<pallas_src>
import functools

import jax
import jax.numpy as jnp
from jax.experimental import pallas as pl
from jax.experimental.pallas import tpu as pltpu


def _conv3x3_kernel(x_ref, w_ref, b_ref, o_ref, xp_ref, *, H, W):
    """3x3 'same' conv for one batch element, NCHW-native, spatial flat on lanes.

    x_ref:  (1, Cin, H*W)   unpadded flattened spatial input (lane-dense)
    w_ref:  (9, Cout, Cin)  tap-major weights, tap index t = dy*3 + dx
    b_ref:  (Cout, 1)       bias (lane-broadcasts over H*W)
    o_ref:  (1, Cout, H*W)  lane-dense output tile
    xp_ref: (Cin, HWpad)    VMEM scratch, HWpad = H*W + 2*(W+1)  (fused pad)
    """
    HW = H * W
    Cin = x_ref.shape[1]
    Cout = o_ref.shape[1]
    pad = W + 1

    # Fused zero-pad: build the padded flat image in VMEM scratch.  Only the
    # two pad stripes are zeroed (tiny masked stores); the middle is a single
    # lane-dense store of the input tile.  Done unconditionally every step so
    # per-core scratch stays valid under megacore "parallel" splitting.
    zstripe = jnp.zeros((Cin, pad), xp_ref.dtype)
    xp_ref[:, :pad] = zstripe
    xp_ref[:, pad + HW:] = zstripe
    xp_ref[:, pad:pad + HW] = x_ref[0]

    xp = xp_ref[...]                              # (Cin, HWpad), load once
    wts = w_ref[...]                              # (9, Cout, Cin), tiny
    bias = b_ref[...].astype(jnp.float32)         # (Cout, 1)

    # Column index (flat index mod W) of every output pixel, used to mask the
    # horizontal taps that would otherwise read across row boundaries.
    col = jax.lax.broadcasted_iota(jnp.int32, (1, HW), 1) % W
    mask_left = col >= 1          # valid when ox == -1
    mask_right = col < (W - 1)    # valid when ox == +1

    acc = jnp.zeros((Cout, HW), jnp.float32)
    for oy in (-1, 0, 1):
        for ox in (-1, 0, 1):
            # Tap (oy, ox) of the 3x3 stencil == static lane shift of the
            # flattened padded image; vertical out-of-range lands in zero pad.
            start = pad + oy * W + ox
            tap = xp[:, start:start + HW]         # (Cin, HW)
            if ox == -1:
                tap = jnp.where(mask_left, tap, 0.0)
            elif ox == 1:
                tap = jnp.where(mask_right, tap, 0.0)
            t = (oy + 1) * 3 + (ox + 1)
            # (Cout, Cin) @ (Cin, H*W) -> (Cout, H*W): MXU output dim = H*W,
            # f32 accumulation (matches PyTorch Conv2d).
            acc = acc + jnp.dot(wts[t], tap, preferred_element_type=jnp.float32)

    # Single lane-dense store of the whole tile (last dim = H*W).
    o_ref[0] = (acc + bias).astype(o_ref.dtype)


def conv2d_3x3_same(x_nchw, weight, bias):
    """self.layer: Conv2d(Cin, hc, kernel_size=3, padding=1), NCHW in / NCHW out."""
    N, Cin, H, W = x_nchw.shape
    Cout = weight.shape[0]
    HW = H * W
    pad = W + 1
    HWpad = HW + 2 * pad

    # NCHW stays NCHW: flattening spatial dims is a free contiguous reshape;
    # no wrapper-side pad or transpose of the activation remains.
    xf = x_nchw.reshape(N, Cin, HW)

    # (Cout, Cin, 3, 3) -> (9, Cout, Cin), tap-major (tiny, one-time).
    w9 = jnp.transpose(weight, (2, 3, 0, 1)).reshape(9, Cout, Cin)
    b = bias.reshape(Cout, 1)

    kernel = functools.partial(_conv3x3_kernel, H=H, W=W)
    out_flat = pl.pallas_call(
        kernel,
        out_shape=jax.ShapeDtypeStruct((N, Cout, HW), x_nchw.dtype),
        grid_spec=pltpu.PrefetchScalarGridSpec(
            num_scalar_prefetch=0,
            grid=(N,),
            in_specs=[
                pl.BlockSpec((1, Cin, HW), lambda n: (n, 0, 0)),
                pl.BlockSpec((9, Cout, Cin), lambda n: (0, 0, 0)),
                pl.BlockSpec((Cout, 1), lambda n: (0, 0)),
            ],
            out_specs=pl.BlockSpec((1, Cout, HW), lambda n: (n, 0, 0)),
            scratch_shapes=[pltpu.VMEM((Cin, HWpad), x_nchw.dtype)],
        ),
        compiler_params=pltpu.CompilerParams(
            dimension_semantics=("parallel",)),
    )(xf, w9, b)

    # Free contiguous reshape back to NCHW (no transpose).
    return out_flat.reshape(N, Cout, H, W)


class DDOpBase:
    """JAX/Pallas port of DDOpBase (base class, layer = Conv2d(Cin, hc, 3, pad=1))."""

    def __init__(self, hc, op_xlim, op_ylim, overlap, domain_padding,
                 use_coarse_op, in_channels, key):
        self.op_xlim = op_xlim
        self.op_ylim = op_ylim
        self.overlap = overlap
        # Deterministic Conv2d-style init (uniform in +-1/sqrt(fan_in)).
        kw, kb = jax.random.split(key)
        fan_in = in_channels * 3 * 3
        bound = 1.0 / (fan_in ** 0.5)
        self.layer_weight = jax.random.uniform(
            kw, (hc, in_channels, 3, 3), jnp.float32, -bound, bound)
        self.layer_bias = jax.random.uniform(
            kb, (hc,), jnp.float32, -bound, bound)
        # TODO(synk): CoarseOpCNN (self.c) is constructed in __init__ but its
        # definition is not provided and it is unused by DDOpBase.forward, so
        # its parameters are not materialized here.

    def layer(self, t):
        return conv2d_3x3_same(t, self.layer_weight, self.layer_bias)

    def _apply_op(self, *args, **kwargs):
        raise NotImplementedError

    def forward(self, t, global_xlim, global_ylim):
        assert t.ndim == 4
        if self.op_xlim == global_xlim and self.op_ylim == global_ylim:
            return self.layer(t)
        # TODO(synk): get_subdomain_indices + _apply_op subdomain path is
        # abstract (NotImplementedError) in the base class; not translatable.
        return self._apply_op(t, global_xlim, global_ylim)


if __name__ == "__main__":
    key = jax.random.PRNGKey(0)
    k_in, k_param = jax.random.split(key)

    N, Cin, H, W = 2, 4, 16, 16
    hc = 8
    op_xlim = op_ylim = 1.0

    module = DDOpBase(hc=hc, op_xlim=op_xlim, op_ylim=op_ylim, overlap=0.25,
                      domain_padding=0.0, use_coarse_op=False,
                      in_channels=Cin, key=k_param)

    t = jax.random.normal(k_in, (N, Cin, H, W), jnp.float32)

    # Matching-limit path -> self.layer(t) via the Pallas kernel.
    out = module.forward(t, global_xlim=1.0, global_ylim=1.0)
    out = jax.block_until_ready(out)
    assert out.shape == (N, hc, H, W), out.shape

    # Reference check against plain-JAX convolution (NCHW, same padding).
    ref = jax.lax.conv_general_dilated(
        t, module.layer_weight, window_strides=(1, 1), padding="SAME",
        dimension_numbers=("NCHW", "OIHW", "NCHW"),
        precision=jax.lax.Precision.HIGHEST,
    ) + module.layer_bias.reshape(1, hc, 1, 1)
    assert jnp.allclose(out, ref, atol=1e-3, rtol=1e-3), \
        float(jnp.max(jnp.abs(out - ref)))

    print("KERNEL_OK")
</pallas_src>

<mosaic_0001>
module attributes {stable_mosaic.version = 11 : i64} {
  func.func @_conv3x3_kernel(%arg0: i32, %arg1: memref<1x4x256xf32, #tpu.memory_space<vmem>>, %arg2: memref<9x8x4xf32, #tpu.memory_space<vmem>>, %arg3: memref<8x1xf32, #tpu.memory_space<vmem>>, %arg4: memref<1x8x256xf32, #tpu.memory_space<vmem>>, %arg5: memref<4x290xf32, #tpu.memory_space<vmem>>) attributes {dimension_semantics = [#tpu.dimension_semantics<parallel>], iteration_bounds = array<i64: 2>, scalar_prefetch = 0 : i64, scratch_operands = 1 : i64, tpu.core_type = #tpu.core_type<tc>, window_params = [{transform_indices = @transform_0, window_bounds = array<i64: 1, 4, 256>}, {pipeline_mode = #tpu.pipeline_mode<synchronous>, transform_indices = @transform_1, window_bounds = array<i64: 9, 8, 4>}, {pipeline_mode = #tpu.pipeline_mode<synchronous>, transform_indices = @transform_2, window_bounds = array<i64: 8, 1>}, {transform_indices = @transform_3, window_bounds = array<i64: 1, 8, 256>}]} {
    %cst = arith.constant 0.000000e+00 : f32
    %0 = vector.broadcast %cst : f32 to vector<4x17xf32>
    %c0 = arith.constant 0 : index
    %c0_0 = arith.constant 0 : index
    %1 = vector.load %arg5[%c0, %c0_0] : memref<4x290xf32, #tpu.memory_space<vmem>>, vector<4x17xf32>
    tpu.vector_store %arg5[%c0, %c0_0], %0 {strides = array<i32>} : memref<4x290xf32, #tpu.memory_space<vmem>>, vector<4x17xf32>,
    %c0_1 = arith.constant 0 : index
    %c273 = arith.constant 273 : index
    %2 = vector.load %arg5[%c0_1, %c273] : memref<4x290xf32, #tpu.memory_space<vmem>>, vector<4x17xf32>
    tpu.vector_store %arg5[%c0_1, %c273], %0 {strides = array<i32>} : memref<4x290xf32, #tpu.memory_space<vmem>>, vector<4x17xf32>,
    %c0_2 = arith.constant 0 : index
    %c0_3 = arith.constant 0 : index
    %c0_4 = arith.constant 0 : index
    %3 = vector.load %arg1[%c0_2, %c0_3, %c0_4] : memref<1x4x256xf32, #tpu.memory_space<vmem>>, vector<1x4x256xf32>
    %4 = vector.shape_cast %3 : vector<1x4x256xf32> to vector<4x256xf32>
    %c0_5 = arith.constant 0 : index
    %c17 = arith.constant 17 : index
    %5 = vector.load %arg5[%c0_5, %c17] : memref<4x290xf32, #tpu.memory_space<vmem>>, vector<4x256xf32>
    tpu.vector_store %arg5[%c0_5, %c17], %4 {strides = array<i32>} : memref<4x290xf32, #tpu.memory_space<vmem>>, vector<4x256xf32>,
    %c0_6 = arith.constant 0 : index
    %c0_7 = arith.constant 0 : index
    %6 = vector.load %arg5[%c0_6, %c0_7] : memref<4x290xf32, #tpu.memory_space<vmem>>, vector<4x290xf32>
    %c0_8 = arith.constant 0 : index
    %c0_9 = arith.constant 0 : index
    %c0_10 = arith.constant 0 : index
    %7 = vector.load %arg2[%c0_8, %c0_9, %c0_10] : memref<9x8x4xf32, #tpu.memory_space<vmem>>, vector<9x8x4xf32>
    %c0_11 = arith.constant 0 : index
    %c0_12 = arith.constant 0 : index
    %8 = vector.load %arg3[%c0_11, %c0_12] : memref<8x1xf32, #tpu.memory_space<vmem>>, vector<8x1xf32>
    %9 = tpu.iota {dimensions = array<i32: 1>} : vector<1x256xi32>
    %c16_i32 = arith.constant 16 : i32
    %c0_i32 = arith.constant 0 : i32
    %10 = arith.cmpi eq, %c16_i32, %c0_i32 : i32
    %c1_i32 = arith.constant 1 : i32
    %11 = arith.select %10, %c1_i32, %c16_i32 : i32
    %12 = vector.broadcast %11 : i32 to vector<1x256xi32>
    %13 = arith.remsi %9, %12 : vector<1x256xi32>
    %c0_i32_13 = arith.constant 0 : i32
    %14 = vector.broadcast %c0_i32_13 : i32 to vector<1x256xi32>
    %15 = arith.cmpi ne, %13, %14 : vector<1x256xi32>
    %c0_i32_14 = arith.constant 0 : i32
    %16 = vector.broadcast %c0_i32_14 : i32 to vector<1x256xi32>
    %17 = arith.cmpi slt, %13, %16 : vector<1x256xi32>
    %c0_i32_15 = arith.constant 0 : i32
    %18 = arith.cmpi slt, %11, %c0_i32_15 : i32
    %19 = vector.broadcast %18 : i1 to vector<1x256xi1>
    %20 = vector.broadcast %19 : vector<1x256xi1> to vector<1x256xi1>
    %21 = arith.xori %17, %20 : vector<1x256xi1>
    %22 = arith.andi %21, %15 : vector<1x256xi1>
    %23 = vector.broadcast %11 : i32 to vector<1x256xi32>
    %24 = arith.addi %13, %23 : vector<1x256xi32>
    %25 = arith.select %22, %24, %13 : vector<1x256xi1>, vector<1x256xi32>
    %c1_i32_16 = arith.constant 1 : i32
    %26 = vector.broadcast %c1_i32_16 : i32 to vector<1x256xi32>
    %27 = arith.cmpi sge, %25, %26 : vector<1x256xi32>
    %c15_i32 = arith.constant 15 : i32
    %28 = vector.broadcast %c15_i32 : i32 to vector<1x256xi32>
    %29 = arith.cmpi slt, %25, %28 : vector<1x256xi32>
    %cst_17 = arith.constant 0.000000e+00 : f32
    %30 = vector.broadcast %cst_17 : f32 to vector<8x256xf32>
    %31 = vector.extract_strided_slice %6 {offsets = [0, 0], sizes = [4, 256], strides = [1, 1]} : vector<4x290xf32> to vector<4x256xf32>
    %cst_18 = arith.constant 0.000000e+00 : f32
    %32 = vector.shape_cast %27 : vector<1x256xi1> to vector<1x256xi1>
    %33 = vector.broadcast %32 : vector<1x256xi1> to vector<4x256xi1>
    %34 = vector.broadcast %cst_18 : f32 to vector<4x256xf32>
    %35 = arith.select %33, %31, %34 : vector<4x256xi1>, vector<4x256xf32>
    %36 = vector.extract_strided_slice %7 {offsets = [0, 0, 0], sizes = [1, 8, 4], strides = [1, 1, 1]} : vector<9x8x4xf32> to vector<1x8x4xf32>
    %37 = vector.shape_cast %36 : vector<1x8x4xf32> to vector<8x4xf32>
    %cst_19 = arith.constant dense<0.000000e+00> : vector<8x256xf32>
    %38 = tpu.matmul %37, %35, %cst_19 {dimension_numbers = #tpu.dot_dimension_numbers<[1], [0], [0], [1], [0, 0, 1, 1], [], []>} : vector<8x4xf32>, vector<4x256xf32>, vector<8x256xf32> -> vector<8x256xf32>
    %39 = arith.addf %30, %38 : vector<8x256xf32>
    %40 = vector.extract_strided_slice %6 {offsets = [0, 1], sizes = [4, 256], strides = [1, 1]} : vector<4x290xf32> to vector<4x256xf32>
    %41 = vector.extract_strided_slice %7 {offsets = [1, 0, 0], sizes = [1, 8, 4], strides = [1, 1, 1]} : vector<9x8x4xf32> to vector<1x8x4xf32>
    %42 = vector.shape_cast %41 : vector<1x8x4xf32> to vector<8x4xf32>
    %cst_20 = arith.constant dense<0.000000e+00> : vector<8x256xf32>
    %43 = tpu.matmul %42, %40, %cst_20 {dimension_numbers = #tpu.dot_dimension_numbers<[1], [0], [0], [1], [0, 0, 1, 1], [], []>} : vector<8x4xf32>, vector<4x256xf32>, vector<8x256xf32> -> vector<8x256xf32>
    %44 = arith.addf %39, %43 : vector<8x256xf32>
    %45 = vector.extract_strided_slice %6 {offsets = [0, 2], sizes = [4, 256], strides = [1, 1]} : vector<4x290xf32> to vector<4x256xf32>
    %cst_21 = arith.constant 0.000000e+00 : f32
    %46 = vector.shape_cast %29 : vector<1x256xi1> to vector<1x256xi1>
    %47 = vector.broadcast %46 : vector<1x256xi1> to vector<4x256xi1>
    %48 = vector.broadcast %cst_21 : f32 to vector<4x256xf32>
    %49 = arith.select %47, %45, %48 : vector<4x256xi1>, vector<4x256xf32>
    %50 = vector.extract_strided_slice %7 {offsets = [2, 0, 0], sizes = [1, 8, 4], strides = [1, 1, 1]} : vector<9x8x4xf32> to vector<1x8x4xf32>
    %51 = vector.shape_cast %50 : vector<1x8x4xf32> to vector<8x4xf32>
    %cst_22 = arith.constant dense<0.000000e+00> : vector<8x256xf32>
    %52 = tpu.matmul %51, %49, %cst_22 {dimension_numbers = #tpu.dot_dimension_numbers<[1], [0], [0], [1], [0, 0, 1, 1], [], []>} : vector<8x4xf32>, vector<4x256xf32>, vector<8x256xf32> -> vector<8x256xf32>
    %53 = arith.addf %44, %52 : vector<8x256xf32>
    %54 = vector.extract_strided_slice %6 {offsets = [0, 16], sizes = [4, 256], strides = [1, 1]} : vector<4x290xf32> to vector<4x256xf32>
    %cst_23 = arith.constant 0.000000e+00 : f32
    %55 = vector.shape_cast %27 : vector<1x256xi1> to vector<1x256xi1>
    %56 = vector.broadcast %55 : vector<1x256xi1> to vector<4x256xi1>
    %57 = vector.broadcast %cst_23 : f32 to vector<4x256xf32>
    %58 = arith.select %56, %54, %57 : vector<4x256xi1>, vector<4x256xf32>
    %59 = vector.extract_strided_slice %7 {offsets = [3, 0, 0], sizes = [1, 8, 4], strides = [1, 1, 1]} : vector<9x8x4xf32> to vector<1x8x4xf32>
    %60 = vector.shape_cast %59 : vector<1x8x4xf32> to vector<8x4xf32>
    %cst_24 = arith.constant dense<0.000000e+00> : vector<8x256xf32>
    %61 = tpu.matmul %60, %58, %cst_24 {dimension_numbers = #tpu.dot_dimension_numbers<[1], [0], [0], [1], [0, 0, 1, 1], [], []>} : vector<8x4xf32>, vector<4x256xf32>, vector<8x256xf32> -> vector<8x256xf32>
    %62 = arith.addf %53, %61 : vector<8x256xf32>
    %63 = vector.extract_strided_slice %6 {offsets = [0, 17], sizes = [4, 256], strides = [1, 1]} : vector<4x290xf32> to vector<4x256xf32>
    %64 = vector.extract_strided_slice %7 {offsets = [4, 0, 0], sizes = [1, 8, 4], strides = [1, 1, 1]} : vector<9x8x4xf32> to vector<1x8x4xf32>
    %65 = vector.shape_cast %64 : vector<1x8x4xf32> to vector<8x4xf32>
    %cst_25 = arith.constant dense<0.000000e+00> : vector<8x256xf32>
    %66 = tpu.matmul %65, %63, %cst_25 {dimension_numbers = #tpu.dot_dimension_numbers<[1], [0], [0], [1], [0, 0, 1, 1], [], []>} : vector<8x4xf32>, vector<4x256xf32>, vector<8x256xf32> -> vector<8x256xf32>
    %67 = arith.addf %62, %66 : vector<8x256xf32>
    %68 = vector.extract_strided_slice %6 {offsets = [0, 18], sizes = [4, 256], strides = [1, 1]} : vector<4x290xf32> to vector<4x256xf32>
    %cst_26 = arith.constant 0.000000e+00 : f32
    %69 = vector.shape_cast %29 : vector<1x256xi1> to vector<1x256xi1>
    %70 = vector.broadcast %69 : vector<1x256xi1> to vector<4x256xi1>
    %71 = vector.broadcast %cst_26 : f32 to vector<4x256xf32>
    %72 = arith.select %70, %68, %71 : vector<4x256xi1>, vector<4x256xf32>
    %73 = vector.extract_strided_slice %7 {offsets = [5, 0, 0], sizes = [1, 8, 4], strides = [1, 1, 1]} : vector<9x8x4xf32> to vector<1x8x4xf32>
    %74 = vector.shape_cast %73 : vector<1x8x4xf32> to vector<8x4xf32>
    %cst_27 = arith.constant dense<0.000000e+00> : vector<8x256xf32>
    %75 = tpu.matmul %74, %72, %cst_27 {dimension_numbers = #tpu.dot_dimension_numbers<[1], [0], [0], [1], [0, 0, 1, 1], [], []>} : vector<8x4xf32>, vector<4x256xf32>, vector<8x256xf32> -> vector<8x256xf32>
    %76 = arith.addf %67, %75 : vector<8x256xf32>
    %77 = vector.extract_strided_slice %6 {offsets = [0, 32], sizes = [4, 256], strides = [1, 1]} : vector<4x290xf32> to vector<4x256xf32>
    %cst_28 = arith.constant 0.000000e+00 : f32
    %78 = vector.shape_cast %27 : vector<1x256xi1> to vector<1x256xi1>
    %79 = vector.broadcast %78 : vector<1x256xi1> to vector<4x256xi1>
    %80 = vector.broadcast %cst_28 : f32 to vector<4x256xf32>
    %81 = arith.select %79, %77, %80 : vector<4x256xi1>, vector<4x256xf32>
    %82 = vector.extract_strided_slice %7 {offsets = [6, 0, 0], sizes = [1, 8, 4], strides = [1, 1, 1]} : vector<9x8x4xf32> to vector<1x8x4xf32>
    %83 = vector.shape_cast %82 : vector<1x8x4xf32> to vector<8x4xf32>
    %cst_29 = arith.constant dense<0.000000e+00> : vector<8x256xf32>
    %84 = tpu.matmul %83, %81, %cst_29 {dimension_numbers = #tpu.dot_dimension_numbers<[1], [0], [0], [1], [0, 0, 1, 1], [], []>} : vector<8x4xf32>, vector<4x256xf32>, vector<8x256xf32> -> vector<8x256xf32>
    %85 = arith.addf %76, %84 : vector<8x256xf32>
    %86 = vector.extract_strided_slice %6 {offsets = [0, 33], sizes = [4, 256], strides = [1, 1]} : vector<4x290xf32> to vector<4x256xf32>
    %87 = vector.extract_strided_slice %7 {offsets = [7, 0, 0], sizes = [1, 8, 4], strides = [1, 1, 1]} : vector<9x8x4xf32> to vector<1x8x4xf32>
    %88 = vector.shape_cast %87 : vector<1x8x4xf32> to vector<8x4xf32>
    %cst_30 = arith.constant dense<0.000000e+00> : vector<8x256xf32>
    %89 = tpu.matmul %88, %86, %cst_30 {dimension_numbers = #tpu.dot_dimension_numbers<[1], [0], [0], [1], [0, 0, 1, 1], [], []>} : vector<8x4xf32>, vector<4x256xf32>, vector<8x256xf32> -> vector<8x256xf32>
    %90 = arith.addf %85, %89 : vector<8x256xf32>
    %91 = vector.extract_strided_slice %6 {offsets = [0, 34], sizes = [4, 256], strides = [1, 1]} : vector<4x290xf32> to vector<4x256xf32>
    %cst_31 = arith.constant 0.000000e+00 : f32
    %92 = vector.shape_cast %29 : vector<1x256xi1> to vector<1x256xi1>
    %93 = vector.broadcast %92 : vector<1x256xi1> to vector<4x256xi1>
    %94 = vector.broadcast %cst_31 : f32 to vector<4x256xf32>
    %95 = arith.select %93, %91, %94 : vector<4x256xi1>, vector<4x256xf32>
    %96 = vector.extract_strided_slice %7 {offsets = [8, 0, 0], sizes = [1, 8, 4], strides = [1, 1, 1]} : vector<9x8x4xf32> to vector<1x8x4xf32>
    %97 = vector.shape_cast %96 : vector<1x8x4xf32> to vector<8x4xf32>
    %cst_32 = arith.constant dense<0.000000e+00> : vector<8x256xf32>
    %98 = tpu.matmul %97, %95, %cst_32 {dimension_numbers = #tpu.dot_dimension_numbers<[1], [0], [0], [1], [0, 0, 1, 1], [], []>} : vector<8x4xf32>, vector<4x256xf32>, vector<8x256xf32> -> vector<8x256xf32>
    %99 = arith.addf %90, %98 : vector<8x256xf32>
    %100 = vector.broadcast %8 : vector<8x1xf32> to vector<8x256xf32>
    %101 = arith.addf %99, %100 : vector<8x256xf32>
    %c0_33 = arith.constant 0 : index
    %c0_34 = arith.constant 0 : index
    %c0_35 = arith.constant 0 : index
    %102 = vector.load %arg4[%c0_33, %c0_34, %c0_35] : memref<1x8x256xf32, #tpu.memory_space<vmem>>, vector<1x8x256xf32>
    %103 = vector.shape_cast %102 : vector<1x8x256xf32> to vector<8x256xf32>
    %104 = vector.shape_cast %101 : vector<8x256xf32> to vector<1x8x256xf32>
    tpu.vector_store %arg4[%c0_33, %c0_34, %c0_35], %104 {strides = array<i32>} : memref<1x8x256xf32, #tpu.memory_space<vmem>>, vector<1x8x256xf32>,
    return
  }
  func.func @transform_0(%arg0: i32) -> (i32, i32, i32) {
    %c0_i32 = arith.constant 0 : i32
    %c0_i32_0 = arith.constant 0 : i32
    %c0_i32_1 = arith.constant 0 : i32
    return %arg0, %c0_i32, %c0_i32_0 : i32, i32, i32
  }
  func.func @transform_1(%arg0: i32) -> (i32, i32, i32) {
    %c0_i32 = arith.constant 0 : i32
    %c0_i32_0 = arith.constant 0 : i32
    %c0_i32_1 = arith.constant 0 : i32
    %c0_i32_2 = arith.constant 0 : i32
    return %c0_i32, %c0_i32_0, %c0_i32_1 : i32, i32, i32
  }
  func.func @transform_2(%arg0: i32) -> (i32, i32) {
    %c0_i32 = arith.constant 0 : i32
    %c0_i32_0 = arith.constant 0 : i32
    %c0_i32_1 = arith.constant 0 : i32
    return %c0_i32, %c0_i32_0 : i32, i32
  }
  func.func @transform_3(%arg0: i32) -> (i32, i32, i32) {
    %c0_i32 = arith.constant 0 : i32
    %c0_i32_0 = arith.constant 0 : i32
    %c0_i32_1 = arith.constant 0 : i32
    return %arg0, %c0_i32, %c0_i32_0 : i32, i32, i32
  }
}

</mosaic_0001>

<bundles_post_ra>
// kernel: tpu_custom_call.1
= control target key start
LH: loop header
LB: loop body
LE: loop exit
PB: predicated region body
PF: predicated region fallthrough
CT: control target
= control target key end

     0   :  { %8 = vsyncpa [#allocation4], 0  ;;  %s1349_s0 = inlined_call_operand.vmem [shape: f32[2,4,256], index: 0, kind: input, shape index: {}]   ;;  %s1350_s1 = inlined_call_operand.vmem [shape: f32[9,8,4], index: 1, kind: input, shape index: {}]   ;;  %s1351_s2 = inlined_call_operand.vmem [shape: f32[8,1], index: 2, kind: input, shape index: {}]   ;;  %s1352_s3 = inlined_call_operand.hbm [shape: f32[2,8,256], index: 3, kind: output, shape index: {}]  }
   0x1   :  { %10 = vsyncpa [#allocation4 + $0x1], 0  ;;  %s1120_s12 = smov 0   ;;  %s1122_s13 = smov 0  }
   0x2   :  { %s1124_s14 = smov 0   ;;  %s1126_s15 = smov 0  }
   0x3 LB: > { %s1141_s16 = sadd.s32 4294967295, %s1087_s15   ;;  %s923_s17 = sadd.s32 4294967294, %s1087_s15   ;;  %s1087_s15 = sphi %s1126_s15, %s1366_s15   ;;  %s1083_s14 = sphi %s1124_s14, %s1365_s14   ;;  %s1079_s13 = sphi %s1122_s13, %s1364_s13   ;;  %s1075_s12 = sphi %s1120_s12, %s1363_s12  }
   0x4   : > { %s1145_s18 = sadd.s32 1, %s1087_s15   ;;  %s91_s19 = sadd.s32 1, %s1083_s14 }
   0x5   : > { %s88_s20 = ssub.s32 %s1087_s15, %s1145_s18  ;;  %p101_p0 = scmp.ne.s32.totalorder %s1083_s14, %s1079_s13 }
   0x6   : > { %p89_p1 = scmp.eq.s32.totalorder %s88_s20, 0  ;;  %p102_p2 = scmp.eq.s32.totalorder %s1141_s16, 1 }
   0x7   : > { %p107_p3 = scmp.ne.s32.totalorder %s1079_s13, %s1075_s12  ;;  %p108_p4 = scmp.eq.s32.totalorder %s923_s17, 1 }
   0x8   : > { %s1156_s21 = scalar_select %p89_p1, %s1083_s14, %s91_s19  }
   0x9   : > { %p1158_p5 = por %p102_p2, %p101_p0  ;;  %p1162_p6 = por %p108_p4, %p107_p3 }
   0xa   : > { %p926_p7 = scmp.ge.s32.totalorder %s1087_s15, 1  ;;  %p140_p8 = scmp.lt.s32.totalorder %s1087_s15, 3 }
   0xc   : > { %p141_p9 = pnand %p926_p7, %p140_p8 }
   0xd   : > { %p164_p10 = scmp.lt.s32.totalorder (!%p141_p9), %s1141_s16, 1  ;;  %s1090_s29 = smov (!%p141_p9), 17  }
   0xe   : > { %144 = sbr.rel (%p141_p9) target bundleno = 474 (0x1da), region = 32  ;;  %s1091_s30 = smov (!%p141_p9), 127  }
   0xf   : > { %s1092_s4 = smov (!%p141_p9), 126   ;;  %s1093_s5 = smov (!%p141_p9), 112  }
  0x10   : > { %s1094_s6 = smov (!%p141_p9), 111   ;;  %s1095_s7 = smov (!%p141_p9), 110  }
  0x11   : > { %s1096_s8 = smov (!%p141_p9), 96   ;;  %s1097_s9 = smov (!%p141_p9), 95  }
  0x12   : > { %s1098_s10 = smov (!%p141_p9), 94   ;;  %s161_s19 = sand.u32 (!%p141_p9), 1, %s1079_s13  }
  0x13   : > { %vm169_vm0 = vcmask 134144   ;;  %vm171_vm1 = vcmask 273544   ;;  %v1089_v0 = vmov 0.0   ;;  %s165_s24 = scalar_select %p164_p10, %s1141_s16, 1  ;;  %vm182_vm2 = vcmask 1043592   ;;  %v189_v43 = vld [vmem:[%s1350_s1] sm:$0xff] }
  0x14   : > { %170 = vst.msk [vmem:[#allocation2] sm:$0xf] %vm169_vm0, %v1089_v0  ;;  %vm183_vm3 = vcmask 1047556   ;;  %vm178_vm4 = vcmask 138240   ;;  %v199_v4 = vlaneseq  ;;  %vm262_vm7 = vcmask 1043456   ;;  %v190_v52 = vld [vmem:[%s1350_s1 + $0x8] sm:$0xff] }
  0x15   : > { %172 = vst.msk [vmem:[#allocation2 + $0x8] sm:$0xf] %vm171_vm1, %v1089_v0  ;;  %s971_s25 = sshll.u32 %s165_s24, 3  ;;  %vm184_vm5 = vmor %vm183_vm3, %vm182_vm2  ;;  %vm258_vm9 = vcmask 31744   ;;  %vm372_vm11 = vcmask 1031168   ;;  %vm255_vm12 = vcmask 1039360  }
  0x16   : > { %s168_s28 = scalar_lea.vmem %s1349_s0, %s971_s25  ;;  %v1175_v6 = vand.u32 127, %v199_v4  ;;  %v191_v59 = vld [vmem:[%s1350_s1 + $0x10] sm:$0xff]  ;;  %vm442_vm14 = vcmask 916480   ;;  %v192_v63 = vld [vmem:[%s1350_s1 + $0x18] sm:$0xff]  ;;  %vm512_vm15 = vcmask 908288   ;;  %vm646_vm1 = vcmask 785408  }
  0x17   : > { %v173_v1 = vld [vmem:[%s168_s28] sm:$0xff]  ;;  %vm716_vm2 = vcmask 777216   ;;  %v196_v14 = vld [vmem:[%s1350_s1 + $0x38] sm:$0xff]  ;;  %vm780_vm3 = vcmask 769024   ;;  %s927_s20 = sshll.u32 %s161_s19, 4  ;;  %s972_s24 = sshll.u32 %s1141_s16, 4 }
  0x18   : > { %175 = vrot.lane.b32.xlu0 %v173_v1, %s1090_s29  ;;  %v1180_v8 = vadd.s32 128, %v1175_v6  ;;  %v206_v10 = vand.u32 15, %v1175_v6  ;;  %s859_s27 = scalar_lea.hbm %s1352_s3, %s972_s24  ;;  %s163_s28 = scalar_lea.vmem [#allocation3], %s927_s20 }
  0x19   : > { %s861_s29 = sshll.u32 %s163_s28, 4  ;;  %s848_s16 = scalar_lea.sflag [#allocation4], %s161_s19  ;;  %s862_s29 = int_to_ptr.vmem [resolvable:$true] %s861_s29 }
  0x1a   : > { %v213_v11 = vand.u32 15, %v1180_v8  ;;  %vm1190_vm6 = vcmp.ge.s32.totalorder %v206_v10, 1  ;;  %vm1242_vm13 = vcmp.lt.s32.totalorder %v206_v10, 15  ;;  %v198_v10 = vld [vmem:[%s1351_s2] sm:$0xff] }
  0x1c   : > { %vm1196_vm8 = vcmp.ge.s32.totalorder %v213_v11, 1  ;;  %vm1228_vm10 = vcmp.lt.s32.totalorder %v213_v11, 15  ;;  %v1099_v11 = vmov 0  }
  0x1d   : > { %1023 = vset.pattern.permute.xlu1 %v1099_v11  ;;  %1024 = vset.pattern.permute.xlu0 %v1099_v11 }
  0x8a   : > { %v176_v2 = vpop.permute.xlu0 %175 }
  0x8b   : > { %v177_v3 = vrot.slane %v176_v2, 4 }
  0x8d   : > { %v179_v5 = vsel %vm178_vm4, %v177_v3, %v176_v2  ;;  %186 = vst.msk [vmem:[#allocation2 + $0x8] sm:$0xf] %vm169_vm0, %v177_v3  ;;  %vm576_vm0 = vcmask 900096  }
  0x8e   : > { %185 = vst.msk [vmem:[#allocation2] sm:$0xff] %vm184_vm5, %v179_v5  ;;  %v193_v5 = vld [vmem:[%s1350_s1 + $0x20] sm:$0xff] }
  0x94   : > { %v1177_v7 = vld [vmem:[#allocation2 + $0x8] sm:$0xf] }
  0x95   : > { %v1182_v9 = vld [vmem:[#allocation2] sm:$0xff]  ;;  %245 = vst [vmem:[#allocation1 + $0x10] ss:$2 sm:$0xff] %v1177_v7 }
  0x96   : > { %235 = vst [vmem:[#allocation1] ss:$2 sm:$0xff] %v1182_v9 }
  0x9c   : > { %v248_v13 = vld.sshfl [vmem:[#allocation1 + $0x10] sm:$0xff pattern:$0x75316420] }
  0x9d   : > { %253 = vrot.lane.b32.xlu1 %v248_v13, %s1091_s30  ;;  %362 = vst [vmem:[#allocation1 + $0x10] ss:$2 sm:$0xff] %v1177_v7  ;;  %v236_v15 = vld.sshfl [vmem:[#allocation1] sm:$0xff pattern:$0x75316420] }
  0x9e   : > { %v240_v16 = vsel %vm1190_vm6, %v236_v15, 0.0  ;;  %v237_v17 = vld.sshfl [vmem:[#allocation1 + $0x8] sm:$0xff pattern:$0x75316420] }
  0x9f   : > { %934 = vmatpush.msk.msra.mxu2 %vm262_vm7, %v240_v16  ;;  %v241_v18 = vsel %vm1196_vm8, %v237_v17, 0.0  ;;  %243 = vst [vmem:[#allocation1] ss:$2 sm:$0xff] %v1182_v9  ;;  %v194_v16 = vld [vmem:[%s1350_s1 + $0x28] sm:$0xff] }
  0xa0   : > { %936 = vmatpush.msk.msra.mxu3 %vm262_vm7, %v241_v18  ;;  %935 = vmatmul.msk.f32.vlgmr.msra.gmra.mxu2 %vm258_vm9, %v189_v43 }
  0xa1   : > { %937 = vmatmul.msk.f32.vlgmr.msra.gmra.mxu3 %vm258_vm9, %v189_v43 }
  0xa4   : > { %v365_v19 = vld.sshfl [vmem:[#allocation1 + $0x10] sm:$0xff pattern:$0x75316420] }
  0xa5   : > { %370 = vrot.lane.b32.xlu0 %v365_v19, %s1092_s4  ;;  %432 = vst [vmem:[#allocation1 + $0x10] ss:$2 sm:$0xff] %v1177_v7 }
  0xa6   : > { %v247_v20 = vld.sshfl [vmem:[#allocation1 + $0x8] sm:$0xff pattern:$0x75316420]  ;;  %v246_v21 = vld.sshfl [vmem:[#allocation1] sm:$0xff pattern:$0x75316420] }
  0xa7   : > { %251 = vrot.lane.b32.xlu1 %v247_v20, %s1091_s30  ;;  %360 = vst [vmem:[#allocation1] ss:$2 sm:$0xff] %v1182_v9 }
  0xac   : > { %v435_v22 = vld.sshfl [vmem:[#allocation1 + $0x10] sm:$0xff pattern:$0x75316420] }
  0xad   : > { %249 = vrot.lane.b32.xlu0 %v246_v21, %s1091_s30  ;;  %502 = vst [vmem:[#allocation1 + $0x10] ss:$2 sm:$0xff] %v1177_v7  ;;  %s863_s30 = sshll.u32 %s859_s27, 4  ;;  %s864_s30 = int_to_ptr.hbm [resolvable:$true] %s863_s30 }
  0xae   : > { %v363_v23 = vld.sshfl [vmem:[#allocation1] sm:$0xff pattern:$0x75316420]  ;;  %v364_v24 = vld.sshfl [vmem:[#allocation1 + $0x8] sm:$0xff pattern:$0x75316420] }
  0xaf   : > { %366 = vrot.lane.b32.xlu2 %v363_v23, %s1092_s4  ;;  %430 = vst [vmem:[#allocation1] ss:$2 sm:$0xff] %v1182_v9 }
  0xb4   : > { %v505_v25 = vld.sshfl [vmem:[#allocation1 + $0x10] sm:$0xff pattern:$0x75316420] }
  0xb5   : > { %440 = vrot.lane.b32.xlu0 %v435_v22, %s1093_s5  ;;  %566 = vst [vmem:[#allocation1 + $0x10] ss:$2 sm:$0xff] %v1177_v7 }
  0xb6   : > { %v433_v26 = vld.sshfl [vmem:[#allocation1] sm:$0xff pattern:$0x75316420]  ;;  %v434_v27 = vld.sshfl [vmem:[#allocation1 + $0x8] sm:$0xff pattern:$0x75316420] }
  0xb7   : > { %368 = vrot.lane.b32.xlu2 %v364_v24, %s1092_s4  ;;  %436 = vrot.lane.b32.xlu1 %v433_v26, %s1093_s5  ;;  %500 = vst [vmem:[#allocation1] ss:$2 sm:$0xff] %v1182_v9  ;;  %v195_v24 = vld [vmem:[%s1350_s1 + $0x30] sm:$0xff]  ;;  %s1039_s4 = sshra.s32 %s864_s30, 4  ;;  %s1040_s4 = int_to_ptr.hbm [resolvable:$true] %s1039_s4 }
  0xb8   : > { %p1046_p0 = scmp.lt.s32.totalorder %s1040_s4, %s1352_s3 }
  0xbc   : > { %v569_v28 = vld.sshfl [vmem:[#allocation1 + $0x10] sm:$0xff pattern:$0x75316420] }
  0xbd   : > { %510 = vrot.lane.b32.xlu0 %v505_v25, %s1094_s6  ;;  %636 = vst [vmem:[#allocation1 + $0x10] ss:$2 sm:$0xff] %v1177_v7 }
  0xbe   : > { %v503_v29 = vld.sshfl [vmem:[#allocation1] sm:$0xff pattern:$0x75316420]  ;;  %v504_v30 = vld.sshfl [vmem:[#allocation1 + $0x8] sm:$0xff pattern:$0x75316420] }
  0xbf   : > { %438 = vrot.lane.b32.xlu2 %v434_v27, %s1093_s5  ;;  %506 = vrot.lane.b32.xlu1 %v503_v29, %s1094_s6  ;;  %564 = vst [vmem:[#allocation1] ss:$2 sm:$0xff] %v1182_v9  ;;  %s1041_s5 = scalar_lea.hbm %s1040_s4, 16 }
  0xc0   : > { %p1042_p11 = scmp.ne.s32.totalorder %s1040_s4, %s1041_s5 }
  0xc2   : > { %p1043_p12 = pnand %p1042_p11, %p1158_p5 }
  0xc4   : > { %v639_v31 = vld.sshfl [vmem:[#allocation1 + $0x10] sm:$0xff pattern:$0x75316420]  ;;  %p1044_p13 = pneg %p1043_p12 }
  0xc5   : > { %574 = vrot.lane.b32.xlu0 %v569_v28, %s1095_s7  ;;  %706 = vst [vmem:[#allocation1 + $0x10] ss:$2 sm:$0xff] %v1177_v7 }
  0xc6   : > { %v567_v32 = vld.sshfl [vmem:[#allocation1] sm:$0xff pattern:$0x75316420]  ;;  %v568_v33 = vld.sshfl [vmem:[#allocation1 + $0x8] sm:$0xff pattern:$0x75316420] }
  0xc7   : > { %508 = vrot.lane.b32.xlu2 %v504_v30, %s1094_s6  ;;  %570 = vrot.lane.b32.xlu1 %v567_v32, %s1095_s7  ;;  %634 = vst [vmem:[#allocation1] ss:$2 sm:$0xff] %v1182_v9 }
  0xcc   : > { %v709_v34 = vld.sshfl [vmem:[#allocation1 + $0x10] sm:$0xff pattern:$0x75316420] }
  0xcd   : > { %644 = vrot.lane.b32.xlu0 %v639_v31, %s1096_s8  ;;  %770 = vst [vmem:[#allocation1 + $0x10] ss:$2 sm:$0xff] %v1177_v7 }
  0xce   : > { %v637_v35 = vld.sshfl [vmem:[#allocation1] sm:$0xff pattern:$0x75316420]  ;;  %v638_v36 = vld.sshfl [vmem:[#allocation1 + $0x8] sm:$0xff pattern:$0x75316420] }
  0xcf   : > { %572 = vrot.lane.b32.xlu2 %v568_v33, %s1095_s7  ;;  %640 = vrot.lane.b32.xlu1 %v637_v35, %s1096_s8  ;;  %704 = vst [vmem:[#allocation1] ss:$2 sm:$0xff] %v1182_v9 }
  0xd4   : > { %v773_v39 = vld.sshfl [vmem:[#allocation1 + $0x10] sm:$0xff pattern:$0x75316420] }
  0xd5   : > { %714 = vrot.lane.b32.xlu0 %v709_v34, %s1097_s9 }
  0xd6   : > { %v707_v37 = vld.sshfl [vmem:[#allocation1] sm:$0xff pattern:$0x75316420]  ;;  %v708_v38 = vld.sshfl [vmem:[#allocation1 + $0x8] sm:$0xff pattern:$0x75316420] }
  0xd7   : > { %642 = vrot.lane.b32.xlu2 %v638_v36, %s1096_s8  ;;  %710 = vrot.lane.b32.xlu1 %v707_v37, %s1097_s9  ;;  %768 = vst [vmem:[#allocation1] ss:$2 sm:$0xff] %v1182_v9  ;;  %v197_v36 = vld [vmem:[%s1350_s1 + $0x40] sm:$0xff]  ;;  %s1045_s8 = scalar_lea.hbm %s1352_s3, 32 }
  0xd8   : > { %p1047_p1 = scmp.lt.s32.totalorder %s1045_s8, %s1041_s5 }
  0xda   : > { %p1048_p2 = por %p1047_p1, %p1046_p0 }
  0xdc   : > { %p1049_p3 = pnand %p1048_p2, %p1044_p13 }
  0xdd   : > { %778 = vrot.lane.b32.xlu0 %v773_v39, %s1098_s10 }
  0xde   : > { %v771_v40 = vld.sshfl [vmem:[#allocation1] sm:$0xff pattern:$0x75316420]  ;;  %v772_v41 = vld.sshfl [vmem:[#allocation1 + $0x8] sm:$0xff pattern:$0x75316420] }
  0xdf   : > { %712 = vrot.lane.b32.xlu2 %v708_v38, %s1097_s9  ;;  %774 = vrot.lane.b32.xlu1 %v771_v40, %s1098_s10 }
  0xe7   : > { %776 = vrot.lane.b32.xlu2 %v772_v41, %s1098_s10  ;;  %840 = vperm.xlu1 %1023, %v198_v10  }
 0x109   : > { %v367_v42 = vpop.permute.xlu2 %366 }
 0x10f   : > { %v254_v44 = vpop.permute.xlu1 %253 }
 0x111   : > { %v369_v45 = vpop.permute.xlu2 %368 }
 0x112   : > { %v373_v54 = vsel %vm372_vm11, %v367_v42, %v369_v45 }
 0x113   : > { %v377_v58 = vsel %vm1242_vm13, %v373_v54, 0.0 }
 0x117   : > { %v371_v47 = vpop.permute.xlu0 %370 }
 0x118   : > { %v374_v48 = vsel %vm372_vm11, %v369_v45, %v371_v47 }
 0x119   : > { %v252_v49 = vpop.permute.xlu1 %251  ;;  %v378_v50 = vsel %vm1228_vm10, %v374_v48, 0.0  ;;  %v439_v53 = vpop.permute.xlu2 %438 }
 0x11a   : > { %v257_v51 = vsel %vm255_vm12, %v252_v49, %v254_v44 }
 0x11b   : > { %932 = vmatpush.msk.msra.mxu1 %vm262_vm7, %v257_v51 }
 0x11c   : > { %933 = vmatmul.msk.f32.vlgmr.msra.gmra.mxu1 %vm258_vm9, %v190_v52 }
 0x11d   : > { %940 = vmatpush.msk.msrb.mxu1 %vm262_vm7, %v378_v50 }
 0x11f   : > { %v250_v56 = vpop.permute.xlu0 %249 }
 0x120   : > { %v256_v57 = vsel %vm255_vm12, %v250_v56, %v252_v49 }
 0x121   : > { %930 = vmatpush.msk.msra.mxu0 %vm262_vm7, %v256_v57  ;;  %v509_v60 = vpop.permute.xlu2 %508 }
 0x122   : > { %931 = vmatmul.msk.f32.vlgmr.msra.gmra.mxu0 %vm258_vm9, %v190_v52 }
 0x123   : > { %938 = vmatpush.msk.msrb.mxu0 %vm262_vm7, %v377_v58  ;;  %v333_v45 = vpop.f32.mrf.mxu2 }
 0x124   : > { %941 = vmatmul.msk.f32.vlgmr.msrb.gmra.mxu1 %vm258_vm9, %v191_v59  ;;  %v353_v43 = vpop.f32.mrf.mxu3 }
 0x127   : > { %v441_v61 = vpop.permute.xlu0 %440 }
 0x128   : > { %v444_v62 = vsel %vm442_vm14, %v439_v53, %v441_v61 }
 0x129   : > { %v437_v0 = vpop.permute.xlu1 %436  ;;  %v448_v1 = vsel %vm1196_vm8, %v444_v62, 0.0  ;;  %v573_v7 = vpop.permute.xlu2 %572 }
 0x12a   : > { %v443_v2 = vsel %vm442_vm14, %v437_v0, %v439_v53  ;;  %944 = vmatpush.msk.msrb.mxu3 %vm262_vm7, %v448_v1  ;;  %939 = vmatmul.msk.f32.vlgmr.msrb.gmra.mxu0 %vm258_vm9, %v191_v59 }
 0x12b   : > { %v447_v3 = vsel %vm1190_vm6, %v443_v2, 0.0  ;;  %945 = vmatmul.msk.f32.vlgmr.msrb.gmra.mxu3 %vm258_vm9, %v192_v63 }
 0x12c   : > { %942 = vmatpush.msk.msrb.mxu2 %vm262_vm7, %v447_v3 }
 0x12d   : > { %943 = vmatmul.msk.f32.vlgmr.msrb.gmra.mxu2 %vm258_vm9, %v192_v63 }
 0x12f   : > { %v511_v4 = vpop.permute.xlu0 %510 }
 0x130   : > { %v514_v6 = vsel %vm512_vm15, %v509_v60, %v511_v4 }
 0x131   : > { %v507_v8 = vpop.permute.xlu1 %506  ;;  %948 = vmatpush.msk.msra.mxu1 %vm262_vm7, %v514_v6  ;;  %v643_v20 = vpop.permute.xlu2 %642 }
 0x132   : > { %v513_v9 = vsel %vm512_vm15, %v507_v8, %v509_v60  ;;  %949 = vmatmul.msk.f32.vlgmr.msra.gmra.mxu1 %vm258_vm9, %v193_v5 }
 0x133   : > { %946 = vmatpush.msk.msra.mxu0 %vm262_vm7, %v513_v9 }
 0x134   : > { %947 = vmatmul.msk.f32.vlgmr.msra.gmra.mxu0 %vm258_vm9, %v193_v5 }
 0x137   : > { %v575_v13 = vpop.permute.xlu0 %574 }
 0x138   : > { %v578_v15 = vsel %vm576_vm0, %v573_v7, %v575_v13 }
 0x139   : > { %v582_v17 = vsel %vm1228_vm10, %v578_v15, 0.0  ;;  %v571_v18 = vpop.permute.xlu1 %570  ;;  %v713_v29 = vpop.permute.xlu2 %712 }
 0x13a   : > { %v577_v19 = vsel %vm576_vm0, %v571_v18, %v573_v7  ;;  %952 = vmatpush.msk.msra.mxu3 %vm262_vm7, %v582_v17 }
 0x13b   : > { %v581_v21 = vsel %vm1242_vm13, %v577_v19, 0.0  ;;  %953 = vmatmul.msk.f32.vlgmr.msra.gmra.mxu3 %vm258_vm9, %v194_v16 }
 0x13c   : > { %950 = vmatpush.msk.msra.mxu2 %vm262_vm7, %v581_v21 }
 0x13d   : > { %951 = vmatmul.msk.f32.vlgmr.msra.gmra.mxu2 %vm258_vm9, %v194_v16 }
 0x13f   : > { %v645_v22 = vpop.permute.xlu0 %644 }
 0x140   : > { %v648_v23 = vsel %vm646_vm1, %v643_v20, %v645_v22 }
 0x141   : > { %v652_v25 = vsel %vm1196_vm8, %v648_v23, 0.0  ;;  %v641_v26 = vpop.permute.xlu1 %640  ;;  %v777_v12 = vpop.permute.xlu2 %776 }
 0x142   : > { %v647_v27 = vsel %vm646_vm1, %v641_v26, %v643_v20  ;;  %956 = vmatpush.msk.msrb.mxu1 %vm262_vm7, %v652_v25 }
 0x143   : > { %v651_v28 = vsel %vm1190_vm6, %v647_v27, 0.0  ;;  %957 = vmatmul.msk.f32.vlgmr.msrb.gmra.mxu1 %vm258_vm9, %v195_v24 }
 0x144   : > { %954 = vmatpush.msk.msrb.mxu0 %vm262_vm7, %v651_v28 }
 0x145   : > { %955 = vmatmul.msk.f32.vlgmr.msrb.gmra.mxu0 %vm258_vm9, %v195_v24 }
 0x147   : > { %v715_v30 = vpop.permute.xlu0 %714 }
 0x148   : > { %v718_v31 = vsel %vm716_vm2, %v713_v29, %v715_v30 }
 0x149   : > { %v711_v32 = vpop.permute.xlu1 %710  ;;  %960 = vmatpush.msk.msrb.mxu3 %vm262_vm7, %v718_v31 }
 0x14a   : > { %v717_v33 = vsel %vm716_vm2, %v711_v32, %v713_v29  ;;  %961 = vmatmul.msk.f32.vlgmr.msrb.gmra.mxu3 %vm258_vm9, %v196_v14 }
 0x14b   : > { %958 = vmatpush.msk.msrb.mxu2 %vm262_vm7, %v717_v33 }
 0x14c   : > { %959 = vmatmul.msk.f32.vlgmr.msrb.gmra.mxu2 %vm258_vm9, %v196_v14 }
 0x14f   : > { %v779_v34 = vpop.permute.xlu0 %778 }
 0x150   : > { %v782_v35 = vsel %vm780_vm3, %v777_v12, %v779_v34 }
 0x151   : > { %v786_v37 = vsel %vm1228_vm10, %v782_v35, 0.0  ;;  %v775_v38 = vpop.permute.xlu1 %774 }
 0x152   : > { %v781_v39 = vsel %vm780_vm3, %v775_v38, %v777_v12  ;;  %964 = vmatpush.msk.msra.mxu1 %vm262_vm7, %v786_v37 }
 0x153   : > { %v785_v40 = vsel %vm1242_vm13, %v781_v39, 0.0  ;;  %965 = vmatmul.msk.f32.vlgmr.msra.gmra.mxu1 %vm258_vm9, %v197_v36 }
 0x154   : > { %962 = vmatpush.msk.msra.mxu0 %vm262_vm7, %v785_v40 }
 0x155   : > { %963 = vmatmul.msk.f32.vlgmr.msra.gmra.mxu0 %vm258_vm9, %v197_v36 }
 0x159   : > { %v841_v8 = vpop.permute.xlu1 %840 }
 0x199   : > { %v304_v41 = vpop.f32.mrf.mxu1 }
 0x19a   : > { %v354_v47 = vadd.f32 %v353_v43, %v304_v41 }
 0x19f   : > { %v284_v42 = vpop.f32.mrf.mxu0 }
 0x1a0   : > { %v334_v49 = vadd.f32 %v333_v45, %v284_v42 }
 0x1a1   : > { %v425_v44 = vpop.f32.mrf.mxu1 }
 0x1a2   : > { %v429_v50 = vadd.f32 %v425_v44, %v354_v47 }
 0x1a7   : > { %v405_v46 = vpop.f32.mrf.mxu0 }
 0x1a8   : > { %v428_v53 = vadd.f32 %v405_v46, %v334_v49 }
 0x1ae   : > { %v495_v48 = vpop.f32.mrf.mxu3 }
 0x1af   : > { %v559_v51 = vpop.f32.mrf.mxu1  ;;  %v499_v54 = vadd.f32 %v495_v48, %v429_v50 }
 0x1b0   : > { %v475_v52 = vpop.f32.mrf.mxu2 }
 0x1b1   : > { %v539_v55 = vpop.f32.mrf.mxu0  ;;  %v498_v56 = vadd.f32 %v475_v52, %v428_v53  ;;  %v563_v58 = vadd.f32 %v559_v51, %v499_v54 }
 0x1b3   : > { %v562_v60 = vadd.f32 %v539_v55, %v498_v56 }
 0x1be   : > { %v629_v57 = vpop.f32.mrf.mxu3 }
 0x1bf   : > { %v633_v61 = vadd.f32 %v629_v57, %v563_v58 }
 0x1c0   : > { %v609_v59 = vpop.f32.mrf.mxu2  ;;  %v699_v62 = vpop.f32.mrf.mxu1 }
 0x1c1   : > { %v632_v63 = vadd.f32 %v609_v59, %v562_v60  ;;  %v703_v1 = vadd.f32 %v699_v62, %v633_v61 }
 0x1c2   : > { %v679_v0 = vpop.f32.mrf.mxu0 }
 0x1c3   : > { %v702_v3 = vadd.f32 %v679_v0, %v632_v63 }
 0x1cd   : > { %v763_v2 = vpop.f32.mrf.mxu3 }
 0x1ce   : > { %v767_v4 = vadd.f32 %v763_v2, %v703_v1 }
 0x1cf   : > { %v743_v5 = vpop.f32.mrf.mxu2 }
 0x1d0   : > { %v766_v6 = vadd.f32 %v743_v5, %v702_v3  ;;  %v833_v7 = vpop.f32.mrf.mxu1 }
 0x1d1   : > { %v837_v9 = vadd.f32 %v833_v7, %v767_v4 }
 0x1d2   : > { %v813_v10 = vpop.f32.mrf.mxu0 }
 0x1d3   : > { %v836_v11 = vadd.f32 %v813_v10, %v766_v6  ;;  %v844_v13 = vadd.f32 %v841_v8, %v837_v9 }
 0x1d5   : > { %v843_v15 = vadd.f32 %v841_v8, %v836_v11  ;;  %846 = vst [vmem:[%s163_s28 + $0x8] sm:$0xff] %v844_v13 }
 0x1d7   : > { %845 = vst [vmem:[%s163_s28] sm:$0xff] %v843_v15 }
 0x1d8   : > { %1052 = shalt.err (!%p1049_p3)
}
 0x1d9   : > { %973 = dma.vmem_to_hbm [thread:$0]  (%p1158_p5), %s862_s29, 256, %s864_s30, %s848_s16  }
 0x1da PF: > { %p979_p4 = scmp.ge.s32.totalorder %s1087_s15, 2  ;;  %s875_s11 = sand.u32 1, %s1075_s12  }
 0x1db   : > { %s876_s17 = scalar_lea.sflag [#allocation4], %s875_s11 }
 0x1dc   : > { %p976_p7 = pnand %p979_p4, %p1162_p6 }
 0x1de   : > { %p977_p8 = pneg %p976_p7 }
 0x1e0   : > { %1070 = dma.done.wait (%p977_p8), %s876_s17, 256  }
 0x1e1   : > { %1072 = vsyncadd (%p977_p8), %s876_s17, 4294967040  ;;  %p13_p9 = scmp.ge.s32.totalorder %s1145_s18, 4   ;;  %s1363_s12 = smov %s1079_s13 }
 0x1e2   : > { %s1364_s13 = smov %s1083_s14  ;;  %s1365_s14 = smov %s1156_s21 }
 0x1e3   : > { %s1366_s15 = smov %s1145_s18  ;;  %15 = sbr.rel (!%p13_p9) target bundleno = 3 (0x3), region = 75 }
 0x1e8   :  { %882 = vsyncpa [#allocation4], 1 }
 0x1e9   :  { %884 = vsyncpa [#allocation4 + $0x1], 1 }

</bundles_post_ra>
